<compile_context>
chip_gen: v7x
topology: tpu7x:2x2x1
jax: 0.10.0
libtpu: 0.0.40
codegen_flags: <defaults>
</compile_context>

<pallas_src>
import jax
import jax.numpy as jnp
from jax.experimental import pallas as pl
from jax.experimental.pallas import tpu as pltpu


def _round_up(x, m):
    return ((x + m - 1) // m) * m


def ffn_kernel(x_ref, w1_ref, b1_ref, w2_ref, b2_ref, o_ref, acc_ref):
    """One (row-tile i, hidden-tile k) grid step.

    x_ref:   (tm, Dp)  compute-dtype activation rows
    w1_ref:  (Dp, th)  compute-dtype first-layer weight tile
    b1_ref:  (1, th)   f32 first-layer bias tile
    w2_ref:  (th, Dp)  compute-dtype second-layer weight tile
    b2_ref:  (1, Dp)   f32 second-layer bias
    o_ref:   (tm, Dp)  output tile (written only at the last hidden step)
    acc_ref: (tm, Dp)  f32 accumulator, persists across the hidden grid axis
    """
    k = pl.program_id(1)

    @pl.when(k == 0)
    def _init():
        # Fold the second bias into the accumulator init (hoists the broadcast out
        # of the per-step hot path).
        acc_ref[...] = jnp.broadcast_to(b2_ref[...], acc_ref.shape).astype(jnp.float32)

    # fc_1 on this hidden tile: bf16 x bf16 -> f32 accumulate on the MXU.
    h = jnp.dot(x_ref[...], w1_ref[...], preferred_element_type=jnp.float32)
    h = jnp.maximum(h + b1_ref[...], 0.0)          # + bias, ReLU
    # dropout: identity (eval mode).  TODO(synk): training-mode dropout not implemented.

    # fc_2 partial product for this hidden tile, accumulated in f32.
    acc_ref[...] += jnp.dot(h.astype(w2_ref.dtype), w2_ref[...],
                            preferred_element_type=jnp.float32)

    @pl.when(k == pl.num_programs(1) - 1)
    def _finalize():
        o_ref[...] = acc_ref[...].astype(o_ref.dtype)


def _build_ffn_call(Np, Dp, H, tm, th, nk, out_dtype, compute_dtype,
                    single_buffer_weights):
    """Build the pallas_call for the given tiling."""
    dsize = jnp.dtype(compute_dtype).itemsize

    wkw = {}
    if single_buffer_weights:
        # Constant-index weight/bias blocks never change -> one VMEM buffer suffices.
        wkw = dict(pipeline_mode=pl.Buffered(1))

    in_specs = [
        pl.BlockSpec((tm, Dp), lambda i, k: (i, 0)),           # x row tile
        pl.BlockSpec((Dp, th), lambda i, k: (0, k), **wkw),    # W1 tile
        pl.BlockSpec((1, th), lambda i, k: (0, k), **wkw),     # b1 tile (f32)
        pl.BlockSpec((th, Dp), lambda i, k: (k, 0), **wkw),    # W2 tile
        pl.BlockSpec((1, Dp), lambda i, k: (0, 0), **wkw),     # b2 (f32)
    ]
    out_specs = pl.BlockSpec((tm, Dp), lambda i, k: (i, 0))

    # VMEM budget: weight tiles (1 or 2 buffers), biases, double-buffered x/out,
    # f32 accumulator and the f32 intermediate h.
    weight_bufs = 1 if single_buffer_weights else 2
    vmem_bytes = (weight_bufs * 2 * Dp * th * dsize
                  + 2 * (th + Dp) * 4
                  + 2 * 2 * tm * Dp * dsize
                  + tm * Dp * 4
                  + tm * th * 4)
    try:
        vmem_cap = int(pltpu.get_tpu_info().vmem_capacity_bytes)
    except Exception:
        vmem_cap = 64 << 20   # conservative (v7x per-TC VMEM)
    vmem_limit = min(int(vmem_bytes * 1.5) + (4 << 20), int(vmem_cap * 0.9))
    vmem_limit = max(vmem_limit, 16 << 20)

    flops = int(4 * Np * Dp * H)                     # two matmuls
    bytes_accessed = int(2 * Np * Dp * dsize         # x in + out
                         + 2 * Dp * H * dsize        # W1 + W2
                         + (H + Dp) * 4)             # biases

    return pl.pallas_call(
        ffn_kernel,
        out_shape=jax.ShapeDtypeStruct((Np, Dp), out_dtype),
        grid_spec=pltpu.PrefetchScalarGridSpec(
            num_scalar_prefetch=0,
            grid=(Np // tm, nk),                     # rows parallel, hidden (reduction) last
            in_specs=in_specs,
            out_specs=out_specs,
            scratch_shapes=[pltpu.VMEM((tm, Dp), jnp.float32)],
        ),
        compiler_params=pltpu.CompilerParams(
            dimension_semantics=("parallel", "arbitrary"),
            vmem_limit_bytes=int(vmem_limit),
        ),
        cost_estimate=pl.CostEstimate(flops=flops, transcendentals=0,
                                      bytes_accessed=bytes_accessed),
    )


def feed_forward_network(x, w1, b1, w2, b2, *, tm=256, th=None,
                         compute_dtype=jnp.bfloat16):
    """x: (batch, seq, d_model) -> (batch, seq, d_model).

    Weights are (in_features, out_features). Matmuls run in `compute_dtype`
    (bf16 by default) with f32 accumulation; biases are applied in f32.
    """
    B, S, D = x.shape
    H = w1.shape[1]
    N = B * S
    out_dtype = x.dtype
    dsize = jnp.dtype(compute_dtype).itemsize

    # Lane-dense output: pad d_model to a multiple of 128.
    Dp = _round_up(D, 128)

    # Row tile: multiple of the 8-sublane tiling, capped by the (padded) row count.
    tm = max(8, min(_round_up(tm, 8), _round_up(N, 8)))

    # Hidden tile: keep weights resident when they comfortably fit in VMEM,
    # otherwise stream the hidden dimension in multiples of 128.
    if th is None:
        if 2 * Dp * H * dsize <= 48 * 1024 * 1024:
            th = H
        else:
            th = H
            for cand in range(2048, 127, -128):
                if H % cand == 0:
                    th = cand
                    break
    assert H % th == 0, "hidden tile must divide the hidden dimension"
    nk = H // th

    # Keep the f32 intermediate h = (tm, th) to a few MiB (avoid spill regime).
    while tm > 8 and tm * th * 4 > (8 << 20):
        tm //= 2
    tm = max(8, (tm // 8) * 8)
    Np = _round_up(N, tm)

    # ---- one-time wrapper-side dtype conversion and padding (not per grid step) ----
    x_flat = x.reshape(N, D).astype(compute_dtype)
    if Np != N or Dp != D:
        x_flat = jnp.pad(x_flat, ((0, Np - N), (0, Dp - D)))
    w1c = w1.astype(compute_dtype)
    w2c = w2.astype(compute_dtype)
    b1f = b1.reshape(1, H).astype(jnp.float32)
    b2f = b2.reshape(1, D).astype(jnp.float32)
    if Dp != D:
        w1c = jnp.pad(w1c, ((0, Dp - D), (0, 0)))
        w2c = jnp.pad(w2c, ((0, 0), (0, Dp - D)))
        b2f = jnp.pad(b2f, ((0, 0), (0, Dp - D)))

    args = (x_flat, w1c, b1f, w2c, b2f)
    single_buffer = (nk == 1)
    if single_buffer:
        try:
            out_flat = _build_ffn_call(Np, Dp, H, tm, th, nk, out_dtype,
                                       compute_dtype, True)(*args)
        except Exception:
            # pipeline_mode=pl.Buffered(1) unsupported in this jax build -> default buffering.
            out_flat = _build_ffn_call(Np, Dp, H, tm, th, nk, out_dtype,
                                       compute_dtype, False)(*args)
    else:
        out_flat = _build_ffn_call(Np, Dp, H, tm, th, nk, out_dtype,
                                   compute_dtype, False)(*args)

    return out_flat[:N, :D].reshape(B, S, D)


def init_params(key, d_model, forward_expansion=4, dtype=jnp.float32):
    """Deterministic nn.Linear-style init (uniform(-1/sqrt(fan_in), 1/sqrt(fan_in)))."""
    hidden = d_model * forward_expansion
    k1, k2, k3, k4 = jax.random.split(key, 4)
    bound1 = 1.0 / (d_model ** 0.5)
    bound2 = 1.0 / (hidden ** 0.5)
    # weights stored as (in_features, out_features) -- transpose of torch layout
    w1 = jax.random.uniform(k1, (d_model, hidden), dtype, -bound1, bound1)
    b1 = jax.random.uniform(k2, (hidden,), dtype, -bound1, bound1)
    w2 = jax.random.uniform(k3, (hidden, d_model), dtype, -bound2, bound2)
    b2 = jax.random.uniform(k4, (d_model,), dtype, -bound2, bound2)
    return w1, b1, w2, b2


if __name__ == "__main__":
    key = jax.random.PRNGKey(0)
    k_x, k_p = jax.random.split(key)

    batch, seq, d_model = 2, 8, 32
    forward_expansion = 4
    x = jax.random.normal(k_x, (batch, seq, d_model), dtype=jnp.float32)
    w1, b1, w2, b2 = init_params(k_p, d_model, forward_expansion)

    out = feed_forward_network(x, w1, b1, w2, b2)
    out = jax.block_until_ready(out)
    assert out.shape == (batch, seq, d_model)

    # Reference mimicking the kernel's bf16-matmul / f32-accumulate path.
    cd = jnp.bfloat16
    xb, w1b, w2b = x.astype(cd).reshape(-1, d_model), w1.astype(cd), w2.astype(cd)
    h_ref = jnp.maximum(jnp.dot(xb, w1b, preferred_element_type=jnp.float32) + b1, 0.0)
    ref = (jnp.dot(h_ref.astype(cd), w2b, preferred_element_type=jnp.float32) + b2
           ).reshape(batch, seq, d_model)
    assert jnp.allclose(out, ref, atol=2e-2, rtol=2e-2), \
        float(jnp.max(jnp.abs(out - ref)))

    # Loose sanity check against the pure-f32 reference (bf16 rounding only).
    ref_f32 = jnp.maximum(x @ w1 + b1, 0.0) @ w2 + b2
    assert jnp.allclose(out, ref_f32, atol=7e-2, rtol=7e-2)

    print("KERNEL_OK")
</pallas_src>

<mosaic_0001>
module attributes {stable_mosaic.version = 11 : i64} {
  func.func @ffn_kernel(%arg0: i32, %arg1: i32, %arg2: memref<16x128xbf16, #tpu.memory_space<vmem>>, %arg3: memref<128x128xbf16, #tpu.memory_space<vmem>>, %arg4: memref<1x128xf32, #tpu.memory_space<vmem>>, %arg5: memref<128x128xbf16, #tpu.memory_space<vmem>>, %arg6: memref<1x128xf32, #tpu.memory_space<vmem>>, %arg7: memref<16x128xf32, #tpu.memory_space<vmem>>, %arg8: memref<16x128xf32, #tpu.memory_space<vmem>>) attributes {dimension_semantics = [#tpu.dimension_semantics<parallel>, #tpu.dimension_semantics<arbitrary>], iteration_bounds = array<i64: 1, 1>, scalar_prefetch = 0 : i64, scratch_operands = 1 : i64, tpu.core_type = #tpu.core_type<tc>, window_params = [{transform_indices = @transform_0, window_bounds = array<i64: 16, 128>}, {pipeline_mode = #tpu.pipeline_mode<synchronous>, transform_indices = @transform_1, window_bounds = array<i64: 128, 128>}, {pipeline_mode = #tpu.pipeline_mode<synchronous>, transform_indices = @transform_2, window_bounds = array<i64: 1, 128>}, {pipeline_mode = #tpu.pipeline_mode<synchronous>, transform_indices = @transform_3, window_bounds = array<i64: 128, 128>}, {pipeline_mode = #tpu.pipeline_mode<synchronous>, transform_indices = @transform_4, window_bounds = array<i64: 1, 128>}, {transform_indices = @transform_5, window_bounds = array<i64: 16, 128>}]} {
    %c0_i32 = arith.constant 0 : i32
    %0 = arith.cmpi eq, %arg1, %c0_i32 : i32
    %1 = arith.extui %0 : i1 to i32
    %c0_i32_0 = arith.constant 0 : i32
    %2 = arith.cmpi ne, %1, %c0_i32_0 : i32
    scf.if %2 {
      %c0_16 = arith.constant 0 : index
      %c0_17 = arith.constant 0 : index
      %20 = vector.load %arg6[%c0_16, %c0_17] : memref<1x128xf32, #tpu.memory_space<vmem>>, vector<1x128xf32>
      %21 = vector.shape_cast %20 : vector<1x128xf32> to vector<1x128xf32>
      %22 = vector.broadcast %21 : vector<1x128xf32> to vector<16x128xf32>
      %c0_18 = arith.constant 0 : index
      %c0_19 = arith.constant 0 : index
      %23 = vector.load %arg8[%c0_18, %c0_19] : memref<16x128xf32, #tpu.memory_space<vmem>>, vector<16x128xf32>
      tpu.vector_store %arg8[%c0_18, %c0_19], %22 {strides = array<i32>} : memref<16x128xf32, #tpu.memory_space<vmem>>, vector<16x128xf32>,
    } else {
    }
    %c0 = arith.constant 0 : index
    %c0_1 = arith.constant 0 : index
    %3 = vector.load %arg2[%c0, %c0_1] : memref<16x128xbf16, #tpu.memory_space<vmem>>, vector<16x128xbf16>
    %c0_2 = arith.constant 0 : index
    %c0_3 = arith.constant 0 : index
    %4 = vector.load %arg3[%c0_2, %c0_3] : memref<128x128xbf16, #tpu.memory_space<vmem>>, vector<128x128xbf16>
    %cst = arith.constant dense<0.000000e+00> : vector<16x128xf32>
    %5 = tpu.matmul %3, %4, %cst {dimension_numbers = #tpu.dot_dimension_numbers<[1], [0], [0], [1], [0, 0, 1, 1], [], []>} : vector<16x128xbf16>, vector<128x128xbf16>, vector<16x128xf32> -> vector<16x128xf32>
    %c0_4 = arith.constant 0 : index
    %c0_5 = arith.constant 0 : index
    %6 = vector.load %arg4[%c0_4, %c0_5] : memref<1x128xf32, #tpu.memory_space<vmem>>, vector<1x128xf32>
    %7 = vector.broadcast %6 : vector<1x128xf32> to vector<16x128xf32>
    %8 = arith.addf %5, %7 : vector<16x128xf32>
    %cst_6 = arith.constant 0.000000e+00 : f32
    %9 = vector.broadcast %cst_6 : f32 to vector<16x128xf32>
    %10 = arith.maximumf %8, %9 : vector<16x128xf32>
    %c0_7 = arith.constant 0 : index
    %c0_8 = arith.constant 0 : index
    %11 = vector.load %arg8[%c0_7, %c0_8] : memref<16x128xf32, #tpu.memory_space<vmem>>, vector<16x128xf32>
    %12 = arith.truncf %10 : vector<16x128xf32> to vector<16x128xbf16>
    %c0_9 = arith.constant 0 : index
    %c0_10 = arith.constant 0 : index
    %13 = vector.load %arg5[%c0_9, %c0_10] : memref<128x128xbf16, #tpu.memory_space<vmem>>, vector<128x128xbf16>
    %cst_11 = arith.constant dense<0.000000e+00> : vector<16x128xf32>
    %14 = tpu.matmul %12, %13, %cst_11 {dimension_numbers = #tpu.dot_dimension_numbers<[1], [0], [0], [1], [0, 0, 1, 1], [], []>} : vector<16x128xbf16>, vector<128x128xbf16>, vector<16x128xf32> -> vector<16x128xf32>
    %15 = arith.addf %11, %14 : vector<16x128xf32>
    %c0_12 = arith.constant 0 : index
    %c0_13 = arith.constant 0 : index
    %16 = vector.load %arg8[%c0_12, %c0_13] : memref<16x128xf32, #tpu.memory_space<vmem>>, vector<16x128xf32>
    tpu.vector_store %arg8[%c0_12, %c0_13], %15 {strides = array<i32>} : memref<16x128xf32, #tpu.memory_space<vmem>>, vector<16x128xf32>,
    %c0_i32_14 = arith.constant 0 : i32
    %17 = arith.cmpi eq, %arg1, %c0_i32_14 : i32
    %18 = arith.extui %17 : i1 to i32
    %c0_i32_15 = arith.constant 0 : i32
    %19 = arith.cmpi ne, %18, %c0_i32_15 : i32
    scf.if %19 {
      %c0_16 = arith.constant 0 : index
      %c0_17 = arith.constant 0 : index
      %20 = vector.load %arg8[%c0_16, %c0_17] : memref<16x128xf32, #tpu.memory_space<vmem>>, vector<16x128xf32>
      %c0_18 = arith.constant 0 : index
      %c0_19 = arith.constant 0 : index
      %21 = vector.load %arg7[%c0_18, %c0_19] : memref<16x128xf32, #tpu.memory_space<vmem>>, vector<16x128xf32>
      tpu.vector_store %arg7[%c0_18, %c0_19], %20 {strides = array<i32>} : memref<16x128xf32, #tpu.memory_space<vmem>>, vector<16x128xf32>,
    } else {
    }
    return
  }
  func.func @transform_0(%arg0: i32, %arg1: i32) -> (i32, i32) {
    %c0_i32 = arith.constant 0 : i32
    %c0_i32_0 = arith.constant 0 : i32
    return %arg0, %c0_i32 : i32, i32
  }
  func.func @transform_1(%arg0: i32, %arg1: i32) -> (i32, i32) {
    %c0_i32 = arith.constant 0 : i32
    %c0_i32_0 = arith.constant 0 : i32
    return %c0_i32, %arg1 : i32, i32
  }
  func.func @transform_2(%arg0: i32, %arg1: i32) -> (i32, i32) {
    %c0_i32 = arith.constant 0 : i32
    %c0_i32_0 = arith.constant 0 : i32
    return %c0_i32, %arg1 : i32, i32
  }
  func.func @transform_3(%arg0: i32, %arg1: i32) -> (i32, i32) {
    %c0_i32 = arith.constant 0 : i32
    %c0_i32_0 = arith.constant 0 : i32
    return %arg1, %c0_i32 : i32, i32
  }
  func.func @transform_4(%arg0: i32, %arg1: i32) -> (i32, i32) {
    %c0_i32 = arith.constant 0 : i32
    %c0_i32_0 = arith.constant 0 : i32
    %c0_i32_1 = arith.constant 0 : i32
    return %c0_i32, %c0_i32_0 : i32, i32
  }
  func.func @transform_5(%arg0: i32, %arg1: i32) -> (i32, i32) {
    %c0_i32 = arith.constant 0 : i32
    %c0_i32_0 = arith.constant 0 : i32
    return %arg0, %c0_i32 : i32, i32
  }
}

module attributes {stable_mosaic.version = 11 : i64} {
  func.func @ffn_kernel(%arg0: i32, %arg1: i32, %arg2: memref<16x128xbf16, #tpu.memory_space<vmem>>, %arg3: memref<128x128xbf16, #tpu.memory_space<vmem>>, %arg4: memref<1x128xf32, #tpu.memory_space<vmem>>, %arg5: memref<128x128xbf16, #tpu.memory_space<vmem>>, %arg6: memref<1x128xf32, #tpu.memory_space<vmem>>, %arg7: memref<16x128xf32, #tpu.memory_space<vmem>>, %arg8: memref<16x128xf32, #tpu.memory_space<vmem>>) attributes {dimension_semantics = [#tpu.dimension_semantics<parallel>, #tpu.dimension_semantics<arbitrary>], iteration_bounds = array<i64: 1, 1>, scalar_prefetch = 0 : i64, scratch_operands = 1 : i64, tpu.core_type = #tpu.core_type<tc>, window_params = [{transform_indices = @transform_0, window_bounds = array<i64: 16, 128>}, {transform_indices = @transform_1, window_bounds = array<i64: 128, 128>}, {transform_indices = @transform_2, window_bounds = array<i64: 1, 128>}, {transform_indices = @transform_3, window_bounds = array<i64: 128, 128>}, {pipeline_mode = #tpu.pipeline_mode<synchronous>, transform_indices = @transform_4, window_bounds = array<i64: 1, 128>}, {transform_indices = @transform_5, window_bounds = array<i64: 16, 128>}]} {
    %c0_i32 = arith.constant 0 : i32
    %0 = arith.cmpi eq, %arg1, %c0_i32 : i32
    %1 = arith.extui %0 : i1 to i32
    %c0_i32_0 = arith.constant 0 : i32
    %2 = arith.cmpi ne, %1, %c0_i32_0 : i32
    scf.if %2 {
      %c0_16 = arith.constant 0 : index
      %c0_17 = arith.constant 0 : index
      %20 = vector.load %arg6[%c0_16, %c0_17] : memref<1x128xf32, #tpu.memory_space<vmem>>, vector<1x128xf32>
      %21 = vector.shape_cast %20 : vector<1x128xf32> to vector<1x128xf32>
      %22 = vector.broadcast %21 : vector<1x128xf32> to vector<16x128xf32>
      %c0_18 = arith.constant 0 : index
      %c0_19 = arith.constant 0 : index
      %23 = vector.load %arg8[%c0_18, %c0_19] : memref<16x128xf32, #tpu.memory_space<vmem>>, vector<16x128xf32>
      tpu.vector_store %arg8[%c0_18, %c0_19], %22 {strides = array<i32>} : memref<16x128xf32, #tpu.memory_space<vmem>>, vector<16x128xf32>,
    } else {
    }
    %c0 = arith.constant 0 : index
    %c0_1 = arith.constant 0 : index
    %3 = vector.load %arg2[%c0, %c0_1] : memref<16x128xbf16, #tpu.memory_space<vmem>>, vector<16x128xbf16>
    %c0_2 = arith.constant 0 : index
    %c0_3 = arith.constant 0 : index
    %4 = vector.load %arg3[%c0_2, %c0_3] : memref<128x128xbf16, #tpu.memory_space<vmem>>, vector<128x128xbf16>
    %cst = arith.constant dense<0.000000e+00> : vector<16x128xf32>
    %5 = tpu.matmul %3, %4, %cst {dimension_numbers = #tpu.dot_dimension_numbers<[1], [0], [0], [1], [0, 0, 1, 1], [], []>} : vector<16x128xbf16>, vector<128x128xbf16>, vector<16x128xf32> -> vector<16x128xf32>
    %c0_4 = arith.constant 0 : index
    %c0_5 = arith.constant 0 : index
    %6 = vector.load %arg4[%c0_4, %c0_5] : memref<1x128xf32, #tpu.memory_space<vmem>>, vector<1x128xf32>
    %7 = vector.broadcast %6 : vector<1x128xf32> to vector<16x128xf32>
    %8 = arith.addf %5, %7 : vector<16x128xf32>
    %cst_6 = arith.constant 0.000000e+00 : f32
    %9 = vector.broadcast %cst_6 : f32 to vector<16x128xf32>
    %10 = arith.maximumf %8, %9 : vector<16x128xf32>
    %c0_7 = arith.constant 0 : index
    %c0_8 = arith.constant 0 : index
    %11 = vector.load %arg8[%c0_7, %c0_8] : memref<16x128xf32, #tpu.memory_space<vmem>>, vector<16x128xf32>
    %12 = arith.truncf %10 : vector<16x128xf32> to vector<16x128xbf16>
    %c0_9 = arith.constant 0 : index
    %c0_10 = arith.constant 0 : index
    %13 = vector.load %arg5[%c0_9, %c0_10] : memref<128x128xbf16, #tpu.memory_space<vmem>>, vector<128x128xbf16>
    %cst_11 = arith.constant dense<0.000000e+00> : vector<16x128xf32>
    %14 = tpu.matmul %12, %13, %cst_11 {dimension_numbers = #tpu.dot_dimension_numbers<[1], [0], [0], [1], [0, 0, 1, 1], [], []>} : vector<16x128xbf16>, vector<128x128xbf16>, vector<16x128xf32> -> vector<16x128xf32>
    %15 = arith.addf %11, %14 : vector<16x128xf32>
    %c0_12 = arith.constant 0 : index
    %c0_13 = arith.constant 0 : index
    %16 = vector.load %arg8[%c0_12, %c0_13] : memref<16x128xf32, #tpu.memory_space<vmem>>, vector<16x128xf32>
    tpu.vector_store %arg8[%c0_12, %c0_13], %15 {strides = array<i32>} : memref<16x128xf32, #tpu.memory_space<vmem>>, vector<16x128xf32>,
    %c0_i32_14 = arith.constant 0 : i32
    %17 = arith.cmpi eq, %arg1, %c0_i32_14 : i32
    %18 = arith.extui %17 : i1 to i32
    %c0_i32_15 = arith.constant 0 : i32
    %19 = arith.cmpi ne, %18, %c0_i32_15 : i32
    scf.if %19 {
      %c0_16 = arith.constant 0 : index
      %c0_17 = arith.constant 0 : index
      %20 = vector.load %arg8[%c0_16, %c0_17] : memref<16x128xf32, #tpu.memory_space<vmem>>, vector<16x128xf32>
      %c0_18 = arith.constant 0 : index
      %c0_19 = arith.constant 0 : index
      %21 = vector.load %arg7[%c0_18, %c0_19] : memref<16x128xf32, #tpu.memory_space<vmem>>, vector<16x128xf32>
      tpu.vector_store %arg7[%c0_18, %c0_19], %20 {strides = array<i32>} : memref<16x128xf32, #tpu.memory_space<vmem>>, vector<16x128xf32>,
    } else {
    }
    return
  }
  func.func @transform_0(%arg0: i32, %arg1: i32) -> (i32, i32) {
    %c0_i32 = arith.constant 0 : i32
    %c0_i32_0 = arith.constant 0 : i32
    return %arg0, %c0_i32 : i32, i32
  }
  func.func @transform_1(%arg0: i32, %arg1: i32) -> (i32, i32) {
    %c0_i32 = arith.constant 0 : i32
    %c0_i32_0 = arith.constant 0 : i32
    return %c0_i32, %arg1 : i32, i32
  }
  func.func @transform_2(%arg0: i32, %arg1: i32) -> (i32, i32) {
    %c0_i32 = arith.constant 0 : i32
    %c0_i32_0 = arith.constant 0 : i32
    return %c0_i32, %arg1 : i32, i32
  }
  func.func @transform_3(%arg0: i32, %arg1: i32) -> (i32, i32) {
    %c0_i32 = arith.constant 0 : i32
    %c0_i32_0 = arith.constant 0 : i32
    return %arg1, %c0_i32 : i32, i32
  }
  func.func @transform_4(%arg0: i32, %arg1: i32) -> (i32, i32) {
    %c0_i32 = arith.constant 0 : i32
    %c0_i32_0 = arith.constant 0 : i32
    %c0_i32_1 = arith.constant 0 : i32
    return %c0_i32, %c0_i32_0 : i32, i32
  }
  func.func @transform_5(%arg0: i32, %arg1: i32) -> (i32, i32) {
    %c0_i32 = arith.constant 0 : i32
    %c0_i32_0 = arith.constant 0 : i32
    return %arg0, %c0_i32 : i32, i32
  }
}

</mosaic_0001>

<bundles_post_ra>
// kernel: tpu_custom_call.1
= control target key start
LH: loop header
LB: loop body
LE: loop exit
PB: predicated region body
PF: predicated region fallthrough
CT: control target
= control target key end

     0   :  { %10 = vsyncpa [#allocation4], 0  ;;  %s643_s0 = inlined_call_operand.hbm [shape: bf16[16,128], index: 0, kind: input, shape index: {}]   ;;  %s644_s1 = inlined_call_operand.hbm [shape: bf16[128,128], index: 1, kind: input, shape index: {}]   ;;  %s645_s2 = inlined_call_operand.vmem [shape: f32[1,128], index: 2, kind: input, shape index: {}]   ;;  %s646_s3 = inlined_call_operand.hbm [shape: bf16[128,128], index: 3, kind: input, shape index: {}]   ;;  %s647_s4 = inlined_call_operand.vmem [shape: f32[1,128], index: 4, kind: input, shape index: {}]   ;;  %s648_s5 = inlined_call_operand.hbm [shape: f32[16,128], index: 5, kind: output, shape index: {}]  }
   0x1   :  { %11 = vsyncpa [#allocation7], 0 }
   0x2   :  { %12 = vsyncpa [#allocation5], 0  ;;  %s533_s18 = smov [#allocation6]   ;;  %s534_s20 = smov [#allocation3]  }
   0x3   :  { %s30_s19 = sshll.u32 %s533_s18, 4  ;;  %s18_s21 = sshll.u32 %s534_s20, 4  ;;  %s31_s19 = int_to_ptr.vmem [resolvable:$true] %s30_s19  ;;  %s573_s21 = int_to_ptr.vmem [resolvable:$true] %s18_s21 }
   0x4   :  { %s439_s24 = scalar_lea.hbm %s644_s1, 1024 }
   0x5   :  { %p440_p0 = scmp.ne.s32.totalorder %s644_s1, %s439_s24  ;;  %p443_p1 = scmp.lt.u32.totalorder %s439_s24, %s644_s1 }
   0x7   :  { %p445_p2 = pnand %p443_p1, %p440_p0 }
   0x9   :  { %448 = shalt.err (!%p445_p2)
}
   0xa   :  { %s449_s29 = scalar_lea.vmem %s31_s19, 1024  ;;  %p454_p4 = scmp.lt.s32.totalorder %s31_s19, %s31_s19 }
   0xb   :  { %p450_p3 = scmp.ne.s32.totalorder %s31_s19, %s449_s29  ;;  %p455_p5 = scmp.lt.s32.totalorder %s449_s29, %s449_s29 }
   0xd   :  { %p456_p6 = por %p455_p5, %p454_p4 }
   0xf   :  { %p457_p7 = pnand %p456_p6, %p450_p3 }
  0x11   :  { %460 = shalt.err (!%p457_p7)
}
  0x12   :  { %s535_s30 = smov 64   ;;  %s536_s6 = smov 4  }
  0x13   :  { %36 = dma.hbm_to_vmem [thread:$0]  %s644_s1, 1024, %s31_s19, [#allocation7], %s535_s30, %s535_s30, %s536_s6  }
  0x14   :  { %s461_s11 = scalar_lea.hbm %s643_s0, 128 }
  0x15   :  { %p462_p8 = scmp.ne.s32.totalorder %s643_s0, %s461_s11  ;;  %p465_p9 = scmp.lt.u32.totalorder %s461_s11, %s643_s0 }
  0x17   :  { %p467_p10 = pnand %p465_p9, %p462_p8 }
  0x19   :  { %470 = shalt.err (!%p467_p10)
}
  0x1a   :  { %s471_s16 = scalar_lea.vmem %s573_s21, 128  ;;  %p476_p12 = scmp.lt.s32.totalorder %s573_s21, %s573_s21 }
  0x1b   :  { %p472_p11 = scmp.ne.s32.totalorder %s573_s21, %s471_s16  ;;  %p477_p13 = scmp.lt.s32.totalorder %s471_s16, %s471_s16 }
  0x1d   :  { %p478_p0 = por %p477_p13, %p476_p12 }
  0x1f   :  { %p479_p1 = pnand %p478_p0, %p472_p11 }
  0x21   :  { %482 = shalt.err (!%p479_p1)
}
  0x22   :  { %24 = dma.hbm_to_vmem [thread:$0]  %s643_s0, 128, %s573_s21, [#allocation4], %s535_s30, %s535_s30, %s536_s6  }
  0x23   :  { %s537_s18 = smov [#allocation8]   ;;  %s483_s23 = scalar_lea.hbm %s646_s3, 1024 }
  0x24   :  { %s44_s19 = sshll.u32 %s537_s18, 4  ;;  %p484_p2 = scmp.ne.s32.totalorder %s646_s3, %s483_s23  ;;  %s45_s19 = int_to_ptr.vmem [resolvable:$true] %s44_s19 }
  0x25   :  { %p487_p3 = scmp.lt.u32.totalorder %s483_s23, %s646_s3 }
  0x27   :  { %p489_p4 = pnand %p487_p3, %p484_p2 }
  0x29   :  { %492 = shalt.err (!%p489_p4)
}
  0x2a   :  { %s493_s28 = scalar_lea.vmem %s45_s19, 1024  ;;  %p498_p6 = scmp.lt.s32.totalorder %s45_s19, %s45_s19 }
  0x2b   :  { %p494_p5 = scmp.ne.s32.totalorder %s45_s19, %s493_s28  ;;  %p499_p7 = scmp.lt.s32.totalorder %s493_s28, %s493_s28 }
  0x2d   :  { %p500_p8 = por %p499_p7, %p498_p6 }
  0x2f   :  { %p501_p9 = pnand %p500_p8, %p494_p5 }
  0x31   :  { %504 = shalt.err (!%p501_p9)
}
  0x32   :  { %50 = dma.hbm_to_vmem [thread:$0]  %s646_s3, 1024, %s45_s19, [#allocation7], %s535_s30, %s535_s30, %s536_s6  }
  0x33   :  { %527 = dma.done.wait [#allocation4], 128  }
  0x34   :  { %528 = vsyncadd [#allocation4], 4294967168 }
  0x35   :  { %529 = dma.done.wait [#allocation7], 2048  }
  0x36   :  { %530 = vsyncadd [#allocation7], 4294965248  ;;  %v538_v0 = vmov 0.0   ;;  %vm539_vm0 = vmmov 0   ;;  %v422_v1 = vld [vmem:[#allocation6] sm:$0xff]   ;;  %v423_v2 = vld [vmem:[#allocation6 + $0x8] sm:$0xff]  }
  0x37   :  { %372 = vmatprep.subr.bf16.mxu0 %v538_v0  ;;  %388 = vmatprep.mubr.msk.bf16.mxu0 %vm539_vm0, %v538_v0  ;;  %v424_v3 = vld [vmem:[#allocation6 + $0x10] sm:$0xff]   ;;  %v431_v4 = vld [vmem:[#allocation8] sm:$0xff]   ;;  %v425_v5 = vld [vmem:[#allocation6 + $0x18] sm:$0xff]   ;;  %s540_s7 = smov [#allocation9]  }
  0x38   :  { %392 = vmatprep.subr.bf16.mxu1 %v538_v0  ;;  %408 = vmatprep.mubr.msk.bf16.mxu1 %vm539_vm0, %v538_v0  ;;  %v432_v6 = vld [vmem:[#allocation8 + $0x8] sm:$0xff]   ;;  %v426_v7 = vld [vmem:[#allocation6 + $0x20] sm:$0xff]   ;;  %v433_v8 = vld [vmem:[#allocation8 + $0x10] sm:$0xff]   ;;  %s322_s8 = sshll.u32 %s540_s7, 4  ;;  %s323_s8 = int_to_ptr.vmem [resolvable:$true] %s322_s8 }
  0x39   :  { %373 = vmatpush3.bf16.msra.mxu0 %v422_v1  ;;  %393 = vmatpush3.bf16.msra.mxu1 %v431_v4  ;;  %v427_v9 = vld [vmem:[#allocation6 + $0x28] sm:$0xff]   ;;  %v434_v10 = vld [vmem:[#allocation8 + $0x18] sm:$0xff]   ;;  %v428_v11 = vld [vmem:[#allocation6 + $0x30] sm:$0xff]   ;;  %p510_p11 = scmp.lt.s32.totalorder %s323_s8, %s323_s8 }
  0x3a   :  { %374 = vmatprep.subr.bf16.mxu0 %v538_v0  ;;  %394 = vmatprep.subr.bf16.mxu1 %v538_v0  ;;  %v435_v12 = vld [vmem:[#allocation8 + $0x20] sm:$0xff]   ;;  %v429_v13 = vld [vmem:[#allocation6 + $0x38] sm:$0xff]   ;;  %v436_v14 = vld [vmem:[#allocation8 + $0x28] sm:$0xff]  }
  0x3b   :  { %v430_v15 = vld [vmem:[#allocation3] sm:$0xff]   ;;  %v437_v16 = vld [vmem:[#allocation8 + $0x30] sm:$0xff]  }
  0x3c   :  { %v438_v17 = vld [vmem:[#allocation8 + $0x38] sm:$0xff]  }
  0x3d   :  { %375 = vmatpush3.bf16.msra.mxu0 %v423_v2  ;;  %395 = vmatpush3.bf16.msra.mxu1 %v432_v6  ;;  %v336_v18 = vld [vmem:[%s645_s2] ss:$0 sm:$0xff]  ;;  %s505_s2 = scalar_lea.vmem %s323_s8, 256 }
  0x3e   :  { %376 = vmatprep.subr.bf16.mxu0 %v538_v0  ;;  %396 = vmatprep.subr.bf16.mxu1 %v538_v0  ;;  %v335_v28 = vld [vmem:[%s647_s4] ss:$0 sm:$0xff]  ;;  %p506_p10 = scmp.ne.s32.totalorder %s323_s8, %s505_s2  ;;  %p511_p12 = scmp.lt.s32.totalorder %s505_s2, %s505_s2 }
  0x40   :  { %p512_p13 = por %p511_p12, %p510_p11 }
  0x41   :  { %377 = vmatpush3.bf16.msra.mxu0 %v424_v3  ;;  %397 = vmatpush3.bf16.msra.mxu1 %v433_v8 }
  0x42   :  { %378 = vmatprep.subr.bf16.mxu0 %v538_v0  ;;  %398 = vmatprep.subr.bf16.mxu1 %v538_v0  ;;  %p513_p0 = pnand %p512_p13, %p506_p10 }
  0x45   :  { %379 = vmatpush3.bf16.msra.mxu0 %v425_v5  ;;  %399 = vmatpush3.bf16.msra.mxu1 %v434_v10 }
  0x46   :  { %380 = vmatprep.subr.bf16.mxu0 %v538_v0  ;;  %400 = vmatprep.subr.bf16.mxu1 %v538_v0 }
  0x49   :  { %381 = vmatpush3.bf16.msra.mxu0 %v426_v7  ;;  %401 = vmatpush3.bf16.msra.mxu1 %v435_v12 }
  0x4a   :  { %382 = vmatprep.subr.bf16.mxu0 %v538_v0  ;;  %402 = vmatprep.subr.bf16.mxu1 %v538_v0 }
  0x4d   :  { %383 = vmatpush3.bf16.msra.mxu0 %v427_v9  ;;  %403 = vmatpush3.bf16.msra.mxu1 %v436_v14 }
  0x4e   :  { %384 = vmatprep.subr.bf16.mxu0 %v538_v0  ;;  %404 = vmatprep.subr.bf16.mxu1 %v538_v0 }
  0x51   :  { %385 = vmatpush3.bf16.msra.mxu0 %v428_v11  ;;  %405 = vmatpush3.bf16.msra.mxu1 %v437_v16 }
  0x52   :  { %386 = vmatprep.subr.bf16.mxu0 %v538_v0  ;;  %406 = vmatprep.subr.bf16.mxu1 %v538_v0 }
  0x55   :  { %387 = vmatpush3.bf16.msra.mxu0 %v429_v13  ;;  %407 = vmatpush3.bf16.msra.mxu1 %v438_v17 }
  0x58   :  { %389 = vmatmul.mubr.bf16.vlgmr.msra.gmra.mrb[0].mxu0 %v430_v15 }
 0x12b   :  { %v189_v19 = vpop.f32.mrb[0].mxu0 }
 0x12c   :  { %v190_v20 = vadd.f32 %v336_v18, %v189_v19  ;;  %v390_v21 = vpop.f32.mrb[1].mxu0 }
 0x12d   :  { %v192_v22 = vpop.f32.mrb[2].mxu0 }
 0x12e   :  { %v193_v23 = vadd.f32 %v336_v18, %v192_v22  ;;  %v391_v24 = vpop.f32.mrb[3].mxu0  ;;  %v196_v25 = vmax.f32 %v190_v20, 0.0 }
 0x130   :  { %v197_v26 = vmax.f32 %v193_v23, 0.0 }
 0x132   :  { %v200_v27 = vpack.c.bf16 %v197_v26, %v196_v25 }
 0x134   :  { %409 = vmatmul.mubr.bf16.vlgmr.msra.gmra.mrb[0].mxu1 %v200_v27 }
 0x207   :  { %v299_v29 = vpop.f32.mrb[0].mxu1 }
 0x208   :  { %v306_v30 = vadd.f32 %v335_v28, %v299_v29  ;;  %v410_v31 = vpop.f32.mrb[1].mxu1 }
 0x209   :  { %v302_v32 = vpop.f32.mrb[2].mxu1 }
 0x20a   :  { %315 = vst [vmem:[#allocation9] sm:$0xff] %v306_v30  ;;  %v307_v33 = vadd.f32 %v335_v28, %v302_v32  ;;  %v411_v34 = vpop.f32.mrb[3].mxu1 }
 0x20c   :  { %316 = vst [vmem:[#allocation9 + $0x8] sm:$0xff] %v307_v33 }
 0x20d   :  { %516 = shalt.err (!%p513_p0)
}
 0x20e   :  { %s517_s10 = scalar_lea.hbm %s648_s5, 256 }
 0x20f   :  { %p518_p1 = scmp.ne.s32.totalorder %s648_s5, %s517_s10  ;;  %p521_p2 = scmp.lt.u32.totalorder %s517_s10, %s648_s5 }
 0x211   :  { %p523_p3 = pnand %p521_p2, %p518_p1 }
 0x213   :  { %526 = shalt.err (!%p523_p3)
}
 0x214   :  { %s541_s15 = smov 128   ;;  %s542_s16 = smov 8  }
 0x215   :  { %328 = dma.vmem_to_hbm [thread:$0]  %s323_s8, 256, %s648_s5, [#allocation5], %s541_s15, %s541_s15, %s542_s16  }
 0x216   :  { %531 = dma.done.wait [#allocation5], 256  }
 0x217   :  { %532 = vsyncadd [#allocation5], 4294967040 }
 0x218   :  { %332 = vsyncpa [#allocation4], 1 }
 0x219   :  { %333 = vsyncpa [#allocation7], 1 }
 0x21a   :  { %334 = vsyncpa [#allocation5], 1 }

// kernel: tpu_custom_call.1
= control target key start
LH: loop header
LB: loop body
LE: loop exit
PB: predicated region body
PF: predicated region fallthrough
CT: control target
= control target key end

     0   :  { %10 = vsyncpa [#allocation4], 0  ;;  %s643_s0 = inlined_call_operand.hbm [shape: bf16[16,128], index: 0, kind: input, shape index: {}]   ;;  %s644_s1 = inlined_call_operand.hbm [shape: bf16[128,128], index: 1, kind: input, shape index: {}]   ;;  %s645_s2 = inlined_call_operand.vmem [shape: f32[1,128], index: 2, kind: input, shape index: {}]   ;;  %s646_s3 = inlined_call_operand.hbm [shape: bf16[128,128], index: 3, kind: input, shape index: {}]   ;;  %s647_s4 = inlined_call_operand.vmem [shape: f32[1,128], index: 4, kind: input, shape index: {}]   ;;  %s648_s5 = inlined_call_operand.hbm [shape: f32[16,128], index: 5, kind: output, shape index: {}]  }
   0x1   :  { %11 = vsyncpa [#allocation7], 0 }
   0x2   :  { %12 = vsyncpa [#allocation5], 0  ;;  %s533_s18 = smov [#allocation6]   ;;  %s534_s20 = smov [#allocation3]  }
   0x3   :  { %s30_s19 = sshll.u32 %s533_s18, 4  ;;  %s18_s21 = sshll.u32 %s534_s20, 4  ;;  %s31_s19 = int_to_ptr.vmem [resolvable:$true] %s30_s19  ;;  %s573_s21 = int_to_ptr.vmem [resolvable:$true] %s18_s21 }
   0x4   :  { %s439_s24 = scalar_lea.hbm %s644_s1, 1024 }
   0x5   :  { %p440_p0 = scmp.ne.s32.totalorder %s644_s1, %s439_s24  ;;  %p443_p1 = scmp.lt.u32.totalorder %s439_s24, %s644_s1 }
   0x7   :  { %p445_p2 = pnand %p443_p1, %p440_p0 }
   0x9   :  { %448 = shalt.err (!%p445_p2)
}
   0xa   :  { %s449_s29 = scalar_lea.vmem %s31_s19, 1024  ;;  %p454_p4 = scmp.lt.s32.totalorder %s31_s19, %s31_s19 }
   0xb   :  { %p450_p3 = scmp.ne.s32.totalorder %s31_s19, %s449_s29  ;;  %p455_p5 = scmp.lt.s32.totalorder %s449_s29, %s449_s29 }
   0xd   :  { %p456_p6 = por %p455_p5, %p454_p4 }
   0xf   :  { %p457_p7 = pnand %p456_p6, %p450_p3 }
  0x11   :  { %460 = shalt.err (!%p457_p7)
}
  0x12   :  { %s535_s30 = smov 64   ;;  %s536_s6 = smov 4  }
  0x13   :  { %36 = dma.hbm_to_vmem [thread:$0]  %s644_s1, 1024, %s31_s19, [#allocation7], %s535_s30, %s535_s30, %s536_s6  }
  0x14   :  { %s461_s11 = scalar_lea.hbm %s643_s0, 128 }
  0x15   :  { %p462_p8 = scmp.ne.s32.totalorder %s643_s0, %s461_s11  ;;  %p465_p9 = scmp.lt.u32.totalorder %s461_s11, %s643_s0 }
  0x17   :  { %p467_p10 = pnand %p465_p9, %p462_p8 }
  0x19   :  { %470 = shalt.err (!%p467_p10)
}
  0x1a   :  { %s471_s16 = scalar_lea.vmem %s573_s21, 128  ;;  %p476_p12 = scmp.lt.s32.totalorder %s573_s21, %s573_s21 }
  0x1b   :  { %p472_p11 = scmp.ne.s32.totalorder %s573_s21, %s471_s16  ;;  %p477_p13 = scmp.lt.s32.totalorder %s471_s16, %s471_s16 }
  0x1d   :  { %p478_p0 = por %p477_p13, %p476_p12 }
  0x1f   :  { %p479_p1 = pnand %p478_p0, %p472_p11 }
  0x21   :  { %482 = shalt.err (!%p479_p1)
}
  0x22   :  { %24 = dma.hbm_to_vmem [thread:$0]  %s643_s0, 128, %s573_s21, [#allocation4], %s535_s30, %s535_s30, %s536_s6  }
  0x23   :  { %s537_s18 = smov [#allocation8]   ;;  %s483_s23 = scalar_lea.hbm %s646_s3, 1024 }
  0x24   :  { %s44_s19 = sshll.u32 %s537_s18, 4  ;;  %p484_p2 = scmp.ne.s32.totalorder %s646_s3, %s483_s23  ;;  %s45_s19 = int_to_ptr.vmem [resolvable:$true] %s44_s19 }
  0x25   :  { %p487_p3 = scmp.lt.u32.totalorder %s483_s23, %s646_s3 }
  0x27   :  { %p489_p4 = pnand %p487_p3, %p484_p2 }
  0x29   :  { %492 = shalt.err (!%p489_p4)
}
  0x2a   :  { %s493_s28 = scalar_lea.vmem %s45_s19, 1024  ;;  %p498_p6 = scmp.lt.s32.totalorder %s45_s19, %s45_s19 }
  0x2b   :  { %p494_p5 = scmp.ne.s32.totalorder %s45_s19, %s493_s28  ;;  %p499_p7 = scmp.lt.s32.totalorder %s493_s28, %s493_s28 }
  0x2d   :  { %p500_p8 = por %p499_p7, %p498_p6 }
  0x2f   :  { %p501_p9 = pnand %p500_p8, %p494_p5 }
  0x31   :  { %504 = shalt.err (!%p501_p9)
}
  0x32   :  { %50 = dma.hbm_to_vmem [thread:$0]  %s646_s3, 1024, %s45_s19, [#allocation7], %s535_s30, %s535_s30, %s536_s6  }
  0x33   :  { %527 = dma.done.wait [#allocation4], 128  }
  0x34   :  { %528 = vsyncadd [#allocation4], 4294967168 }
  0x35   :  { %529 = dma.done.wait [#allocation7], 2048  }
  0x36   :  { %530 = vsyncadd [#allocation7], 4294965248  ;;  %v538_v0 = vmov 0.0   ;;  %vm539_vm0 = vmmov 0   ;;  %v422_v1 = vld [vmem:[#allocation6] sm:$0xff]   ;;  %v423_v2 = vld [vmem:[#allocation6 + $0x8] sm:$0xff]  }
  0x37   :  { %372 = vmatprep.subr.bf16.mxu0 %v538_v0  ;;  %388 = vmatprep.mubr.msk.bf16.mxu0 %vm539_vm0, %v538_v0  ;;  %v424_v3 = vld [vmem:[#allocation6 + $0x10] sm:$0xff]   ;;  %v431_v4 = vld [vmem:[#allocation8] sm:$0xff]   ;;  %v425_v5 = vld [vmem:[#allocation6 + $0x18] sm:$0xff]   ;;  %s540_s7 = smov [#allocation9]  }
  0x38   :  { %392 = vmatprep.subr.bf16.mxu1 %v538_v0  ;;  %408 = vmatprep.mubr.msk.bf16.mxu1 %vm539_vm0, %v538_v0  ;;  %v432_v6 = vld [vmem:[#allocation8 + $0x8] sm:$0xff]   ;;  %v426_v7 = vld [vmem:[#allocation6 + $0x20] sm:$0xff]   ;;  %v433_v8 = vld [vmem:[#allocation8 + $0x10] sm:$0xff]   ;;  %s322_s8 = sshll.u32 %s540_s7, 4  ;;  %s323_s8 = int_to_ptr.vmem [resolvable:$true] %s322_s8 }
  0x39   :  { %373 = vmatpush3.bf16.msra.mxu0 %v422_v1  ;;  %393 = vmatpush3.bf16.msra.mxu1 %v431_v4  ;;  %v427_v9 = vld [vmem:[#allocation6 + $0x28] sm:$0xff]   ;;  %v434_v10 = vld [vmem:[#allocation8 + $0x18] sm:$0xff]   ;;  %v428_v11 = vld [vmem:[#allocation6 + $0x30] sm:$0xff]   ;;  %p510_p11 = scmp.lt.s32.totalorder %s323_s8, %s323_s8 }
  0x3a   :  { %374 = vmatprep.subr.bf16.mxu0 %v538_v0  ;;  %394 = vmatprep.subr.bf16.mxu1 %v538_v0  ;;  %v435_v12 = vld [vmem:[#allocation8 + $0x20] sm:$0xff]   ;;  %v429_v13 = vld [vmem:[#allocation6 + $0x38] sm:$0xff]   ;;  %v436_v14 = vld [vmem:[#allocation8 + $0x28] sm:$0xff]  }
  0x3b   :  { %v430_v15 = vld [vmem:[#allocation3] sm:$0xff]   ;;  %v437_v16 = vld [vmem:[#allocation8 + $0x30] sm:$0xff]  }
  0x3c   :  { %v438_v17 = vld [vmem:[#allocation8 + $0x38] sm:$0xff]  }
  0x3d   :  { %375 = vmatpush3.bf16.msra.mxu0 %v423_v2  ;;  %395 = vmatpush3.bf16.msra.mxu1 %v432_v6  ;;  %v336_v18 = vld [vmem:[%s645_s2] ss:$0 sm:$0xff]  ;;  %s505_s2 = scalar_lea.vmem %s323_s8, 256 }
  0x3e   :  { %376 = vmatprep.subr.bf16.mxu0 %v538_v0  ;;  %396 = vmatprep.subr.bf16.mxu1 %v538_v0  ;;  %v335_v28 = vld [vmem:[%s647_s4] ss:$0 sm:$0xff]  ;;  %p506_p10 = scmp.ne.s32.totalorder %s323_s8, %s505_s2  ;;  %p511_p12 = scmp.lt.s32.totalorder %s505_s2, %s505_s2 }
  0x40   :  { %p512_p13 = por %p511_p12, %p510_p11 }
  0x41   :  { %377 = vmatpush3.bf16.msra.mxu0 %v424_v3  ;;  %397 = vmatpush3.bf16.msra.mxu1 %v433_v8 }
  0x42   :  { %378 = vmatprep.subr.bf16.mxu0 %v538_v0  ;;  %398 = vmatprep.subr.bf16.mxu1 %v538_v0  ;;  %p513_p0 = pnand %p512_p13, %p506_p10 }
  0x45   :  { %379 = vmatpush3.bf16.msra.mxu0 %v425_v5  ;;  %399 = vmatpush3.bf16.msra.mxu1 %v434_v10 }
  0x46   :  { %380 = vmatprep.subr.bf16.mxu0 %v538_v0  ;;  %400 = vmatprep.subr.bf16.mxu1 %v538_v0 }
  0x49   :  { %381 = vmatpush3.bf16.msra.mxu0 %v426_v7  ;;  %401 = vmatpush3.bf16.msra.mxu1 %v435_v12 }
  0x4a   :  { %382 = vmatprep.subr.bf16.mxu0 %v538_v0  ;;  %402 = vmatprep.subr.bf16.mxu1 %v538_v0 }
  0x4d   :  { %383 = vmatpush3.bf16.msra.mxu0 %v427_v9  ;;  %403 = vmatpush3.bf16.msra.mxu1 %v436_v14 }
  0x4e   :  { %384 = vmatprep.subr.bf16.mxu0 %v538_v0  ;;  %404 = vmatprep.subr.bf16.mxu1 %v538_v0 }
  0x51   :  { %385 = vmatpush3.bf16.msra.mxu0 %v428_v11  ;;  %405 = vmatpush3.bf16.msra.mxu1 %v437_v16 }
  0x52   :  { %386 = vmatprep.subr.bf16.mxu0 %v538_v0  ;;  %406 = vmatprep.subr.bf16.mxu1 %v538_v0 }
  0x55   :  { %387 = vmatpush3.bf16.msra.mxu0 %v429_v13  ;;  %407 = vmatpush3.bf16.msra.mxu1 %v438_v17 }
  0x58   :  { %389 = vmatmul.mubr.bf16.vlgmr.msra.gmra.mrb[0].mxu0 %v430_v15 }
 0x12b   :  { %v189_v19 = vpop.f32.mrb[0].mxu0 }
 0x12c   :  { %v190_v20 = vadd.f32 %v336_v18, %v189_v19  ;;  %v390_v21 = vpop.f32.mrb[1].mxu0 }
 0x12d   :  { %v192_v22 = vpop.f32.mrb[2].mxu0 }
 0x12e   :  { %v193_v23 = vadd.f32 %v336_v18, %v192_v22  ;;  %v391_v24 = vpop.f32.mrb[3].mxu0  ;;  %v196_v25 = vmax.f32 %v190_v20, 0.0 }
 0x130   :  { %v197_v26 = vmax.f32 %v193_v23, 0.0 }
 0x132   :  { %v200_v27 = vpack.c.bf16 %v197_v26, %v196_v25 }
 0x134   :  { %409 = vmatmul.mubr.bf16.vlgmr.msra.gmra.mrb[0].mxu1 %v200_v27 }
 0x207   :  { %v299_v29 = vpop.f32.mrb[0].mxu1 }
 0x208   :  { %v306_v30 = vadd.f32 %v335_v28, %v299_v29  ;;  %v410_v31 = vpop.f32.mrb[1].mxu1 }
 0x209   :  { %v302_v32 = vpop.f32.mrb[2].mxu1 }
 0x20a   :  { %315 = vst [vmem:[#allocation9] sm:$0xff] %v306_v30  ;;  %v307_v33 = vadd.f32 %v335_v28, %v302_v32  ;;  %v411_v34 = vpop.f32.mrb[3].mxu1 }
 0x20c   :  { %316 = vst [vmem:[#allocation9 + $0x8] sm:$0xff] %v307_v33 }
 0x20d   :  { %516 = shalt.err (!%p513_p0)
}
 0x20e   :  { %s517_s10 = scalar_lea.hbm %s648_s5, 256 }
 0x20f   :  { %p518_p1 = scmp.ne.s32.totalorder %s648_s5, %s517_s10  ;;  %p521_p2 = scmp.lt.u32.totalorder %s517_s10, %s648_s5 }
 0x211   :  { %p523_p3 = pnand %p521_p2, %p518_p1 }
 0x213   :  { %526 = shalt.err (!%p523_p3)
}
 0x214   :  { %s541_s15 = smov 128   ;;  %s542_s16 = smov 8  }
 0x215   :  { %328 = dma.vmem_to_hbm [thread:$0]  %s323_s8, 256, %s648_s5, [#allocation5], %s541_s15, %s541_s15, %s542_s16  }
 0x216   :  { %531 = dma.done.wait [#allocation5], 256  }
 0x217   :  { %532 = vsyncadd [#allocation5], 4294967040 }
 0x218   :  { %332 = vsyncpa [#allocation4], 1 }
 0x219   :  { %333 = vsyncpa [#allocation7], 1 }
 0x21a   :  { %334 = vsyncpa [#allocation5], 1 }

</bundles_post_ra>
